<compile_context>
chip_gen: v5e
topology: v5e:2x2
jax: 0.10.0
libtpu: 0.0.40
codegen_flags: <defaults>
</compile_context>

<pallas_src>
import functools

import jax
import jax.numpy as jnp
from jax.experimental import pallas as pl
from jax.experimental.pallas import tpu as pltpu


_LANES = 512            # lane-dense last dim (multiple of 128)
_TILE_ROWS = 1024       # 1024 * 512 * 4B = 2 MiB per f32 tile (tiled path)
_FUSED_MAX_ROWS = 1024  # <= 2 MiB f32 slab -> single fused VMEM-resident call


# --------------------------------------------------------------------------- #
# Fused path (small / medium tensors): stats + apply in one kernel invocation #
# --------------------------------------------------------------------------- #
def _fused_kernel(x_ref, o_ref, *, w_bit: int, n_elem: int):
    rows, lanes = x_ref.shape
    x = x_ref[...].astype(jnp.float32)

    n = jnp.float32(n_elem)
    mean = jnp.sum(x) / n                       # pad elements are exact zeros
    d = x - mean

    # Two-pass variance (cancellation-safe).  If the slab was zero-padded to a
    # 512 multiple, exclude the padded tail from the squared-deviation sum.
    if rows * lanes != n_elem:
        idx = (jax.lax.broadcasted_iota(jnp.int32, x.shape, 0) * lanes
               + jax.lax.broadcasted_iota(jnp.int32, x.shape, 1))
        d_stats = jnp.where(idx < n_elem, d, 0.0)
    else:
        d_stats = d
    denom = jnp.float32(max(n_elem - 1, 1))     # torch.std is unbiased (ddof=1)
    var = jnp.maximum(jnp.sum(d_stats * d_stats) / denom, 0.0)
    inv = jax.lax.rsqrt(2.0 * var)              # 1 / (std * sqrt(2))

    weight_cdf = 0.5 * (1.0 + jax.lax.erf(d * inv))
    if w_bit == 1:
        # Reference quirk: sign of a CDF in [0,1] -> essentially all ones.
        q = jnp.sign(weight_cdf)
    else:
        lv = float(2 ** w_bit - 1)
        q = jnp.round(weight_cdf * lv) * (1.0 / lv)
    o_ref[...] = (q * 2.0 - 1.0).astype(o_ref.dtype)


# --------------------------------------------------------------------------- #
# Tiled path (large tensors): phase-1 stats reduction + phase-2 apply         #
# --------------------------------------------------------------------------- #
def _stats_kernel(x_ref, acc_ref, *, tile_rows: int, tiles_per_core: int,
                  valid_rows: int, ragged: bool):
    """Accumulate per-sublane partial sum / sum-of-squares (pure VALU)."""
    @pl.when(pl.program_id(1) == 0)
    def _():
        acc_ref[...] = jnp.zeros_like(acc_ref)

    x = x_ref[...].astype(jnp.float32)

    if ragged:
        # Mask rows beyond the valid extent (partial last tile / clamped
        # duplicate tile on the odd-count core).
        t = pl.program_id(0) * tiles_per_core + pl.program_id(1)
        rem = valid_rows - t * tile_rows
        row = jax.lax.broadcasted_iota(jnp.int32, x.shape, 0)
        x = jnp.where(row < rem, x, 0.0)

    # Layout-preserving view: (tile_rows, 512) -> (tile_rows/8, 8, 512).
    x3 = x.reshape(tile_rows // 8, 8, _LANES)
    acc_ref[0:8, :] += jnp.sum(x3, axis=0)           # per-sublane partial sum
    acc_ref[8:16, :] += jnp.sum(x3 * x3, axis=0)     # per-sublane partial sumsq


def _apply_kernel(stat_ref, x_ref, o_ref, *, w_bit: int):
    """Elementwise normal CDF (precomputed mean / 1/(std*sqrt2)) + quantize."""
    mean = stat_ref[0]        # scalar f32 from SMEM
    inv_denom = stat_ref[1]   # 1 / (std * sqrt(2))

    x = x_ref[...].astype(jnp.float32)
    weight_cdf = 0.5 * (1.0 + jax.lax.erf((x - mean) * inv_denom))

    if w_bit == 1:
        q = jnp.sign(weight_cdf)
    else:
        lv = float(2 ** w_bit - 1)
        q = jnp.round(weight_cdf * lv) * (1.0 / lv)
    o_ref[...] = (q * 2.0 - 1.0).astype(o_ref.dtype)


def _tiled_path(x2d, w_bit: int, n_elem: int, out_dtype):
    rows = x2d.shape[0]
    tile_rows = _TILE_ROWS                       # multiple of 32: safe for any dtype packing
    n_blocks = -(-rows // tile_rows)             # real row-blocks
    tiles_per_core = -(-n_blocks // 2)           # leading size-2 'parallel' axis (v7x megacore)
    ragged = (2 * tiles_per_core * tile_rows) != rows

    def x_map(c, i):
        t = c * tiles_per_core + i
        return ((jnp.minimum(t, n_blocks - 1), 0) if ragged else (t, 0))

    # --- phase 1: per-core, per-sublane partial (sum, sumsq) ---
    part = pl.pallas_call(
        functools.partial(_stats_kernel, tile_rows=tile_rows,
                          tiles_per_core=tiles_per_core,
                          valid_rows=rows, ragged=ragged),
        out_shape=jax.ShapeDtypeStruct((2, 16, _LANES), jnp.float32),
        grid=(2, tiles_per_core),
        in_specs=[pl.BlockSpec((tile_rows, _LANES), x_map)],
        out_specs=pl.BlockSpec((None, 16, _LANES), lambda c, i: (c, 0, 0)),
        compiler_params=pltpu.CompilerParams(
            dimension_semantics=("parallel", "arbitrary"),
            vmem_limit_bytes=32 * 1024 * 1024),
    )(x2d)

    # Tiny scalar epilogue.  One-pass variance is kept here (two-pass would
    # cost an extra full HBM read); weight tensors are ~zero-mean so
    # cancellation is not a practical concern, and var is clamped at 0.
    total = jnp.sum(part[:, 0:8, :])
    sumsq = jnp.sum(part[:, 8:16, :])
    n = jnp.float32(n_elem)
    mean = total / n
    denom = jnp.float32(max(n_elem - 1, 1))
    var = jnp.maximum((sumsq - n * mean * mean) / denom, 0.0)
    inv_denom = jax.lax.rsqrt(2.0 * var)          # 1 / (std * sqrt(2))
    scalars = jnp.stack([mean, inv_denom]).astype(jnp.float32)   # (2,)

    # --- phase 2: tiled elementwise CDF + uniform quantize ---
    out2d = pl.pallas_call(
        functools.partial(_apply_kernel, w_bit=w_bit),
        out_shape=jax.ShapeDtypeStruct((rows, _LANES), out_dtype),
        grid=(n_blocks,),
        in_specs=[
            pl.BlockSpec(memory_space=pltpu.MemorySpace.SMEM),   # (mean, inv_denom)
            pl.BlockSpec((tile_rows, _LANES), lambda i: (i, 0)),
        ],
        out_specs=pl.BlockSpec((tile_rows, _LANES), lambda i: (i, 0)),
        compiler_params=pltpu.CompilerParams(
            dimension_semantics=("parallel",),       # megacore shards on v7x
            vmem_limit_bytes=32 * 1024 * 1024),
    )(scalars, x2d)
    return out2d


@functools.partial(jax.jit, static_argnames=("w_bit",))
def _weight_quantize_impl(x, *, w_bit):
    orig_shape = x.shape
    orig_dtype = x.dtype
    n_elem = x.size

    # Lane-dense 2D slab.  Reshape is free when n_elem is a 512 multiple; only
    # the sub-512 remainder case pays a pad copy + output slice.
    # TODO(synk): handle n_elem % 512 != 0 without the jnp.pad / slice copies.
    x_flat = x.reshape(-1)
    rows = -(-n_elem // _LANES)
    padded = rows * _LANES
    if padded != n_elem:
        x_flat = jnp.pad(x_flat, (0, padded - n_elem))
    x2d = x_flat.reshape(rows, _LANES)

    if rows <= _FUSED_MAX_ROWS:
        # Single fused call: slab stays VMEM-resident, two-pass stats + apply.
        out2d = pl.pallas_call(
            functools.partial(_fused_kernel, w_bit=w_bit, n_elem=n_elem),
            out_shape=jax.ShapeDtypeStruct((rows, _LANES), orig_dtype),
            grid=(1,),
            in_specs=[pl.BlockSpec((rows, _LANES), lambda i: (0, 0))],
            out_specs=pl.BlockSpec((rows, _LANES), lambda i: (0, 0)),
            compiler_params=pltpu.CompilerParams(
                vmem_limit_bytes=32 * 1024 * 1024),
        )(x2d)
    else:
        out2d = _tiled_path(x2d, w_bit, n_elem, orig_dtype)

    out_flat = out2d.reshape(-1)
    if padded != n_elem:
        out_flat = out_flat[:n_elem]
    return out_flat.reshape(orig_shape)


def weight_quantize_fn(x: jax.Array, w_bit: int) -> jax.Array:
    """JAX/Pallas equivalent of weight_quantize_fn(w_bit, stage).forward(x)."""
    if w_bit == 32:
        return x
    return _weight_quantize_impl(x, w_bit=w_bit)


def _reference_jax(x, w_bit):
    """Plain-JAX reference for the correctness check."""
    if w_bit == 32:
        return x
    xf = x.astype(jnp.float32)
    m = jnp.mean(xf)
    s = jnp.std(xf, ddof=1)
    cdf = 0.5 * (1.0 + jax.lax.erf((xf - m) / (s * jnp.sqrt(jnp.float32(2.0)))))
    if w_bit == 1:
        q = jnp.sign(cdf)
    else:
        n = 2 ** w_bit - 1
        q = jnp.round(cdf * n) / n
    return (q * 2.0 - 1.0).astype(x.dtype)


if __name__ == "__main__":
    key = jax.random.PRNGKey(0)
    # Weight-like tensor, NCHW-style layout [out_ch=2, in_ch=4, kH=16, kW=16].
    x = jax.random.normal(key, (2, 4, 16, 16), dtype=jnp.float32)

    W_BIT = 4  # quantization bit-width; `stage` is unused in forward.

    out = weight_quantize_fn(x, W_BIT)
    out = jax.block_until_ready(out)
    assert out.shape == x.shape and out.dtype == x.dtype

    ref = _reference_jax(x, W_BIT)
    # Kernel and reference compute mean/std with different (both f32) reduction
    # orders, so an element whose CDF lands within a few ULPs of a rounding
    # boundary may end up one quantization level apart. Accept exact matches
    # plus (rare) single-level boundary flips.
    level = 2.0 / (2 ** W_BIT - 1)
    diff = jnp.abs(out - ref)
    exact = diff <= 1e-5
    one_level_flip = jnp.abs(diff - level) <= 1e-5
    assert bool(jnp.all(exact | one_level_flip)), "mismatch vs reference"
    assert float(jnp.mean(~exact)) <= 0.01, "too many boundary flips"

    print("KERNEL_OK")
</pallas_src>

<mosaic_0001>
module attributes {stable_mosaic.version = 11 : i64} {
  func.func @_fused_kernel(%arg0: i32, %arg1: memref<4x512xf32, #tpu.memory_space<vmem>>, %arg2: memref<4x512xf32, #tpu.memory_space<vmem>>) attributes {dimension_semantics = [#tpu.dimension_semantics<arbitrary>], iteration_bounds = array<i64: 1>, scalar_prefetch = 0 : i64, scratch_operands = 0 : i64, tpu.core_type = #tpu.core_type<tc>, window_params = [{pipeline_mode = #tpu.pipeline_mode<synchronous>, transform_indices = @transform_0, window_bounds = array<i64: 4, 512>}, {pipeline_mode = #tpu.pipeline_mode<synchronous>, transform_indices = @transform_1, window_bounds = array<i64: 4, 512>}]} {
    %c0 = arith.constant 0 : index
    %c0_0 = arith.constant 0 : index
    %0 = vector.load %arg1[%c0, %c0_0] : memref<4x512xf32, #tpu.memory_space<vmem>>, vector<4x512xf32>
    %1 = vector.shape_cast %0 : vector<4x512xf32> to vector<1x4x512xf32>
    %cst = arith.constant dense<0.000000e+00> : vector<1xf32>
    %2 = vector.multi_reduction <add>, %1, %cst [1, 2] : vector<1x4x512xf32> to vector<1xf32>
    %3 = vector.shape_cast %2 : vector<1xf32> to vector<1x1x1xf32>
    %4 = vector.extract %3[0, 0, 0] : f32 from vector<1x1x1xf32>
    %cst_1 = arith.constant 2.048000e+03 : f32
    %5 = arith.divf %4, %cst_1 : f32
    %6 = vector.broadcast %5 : f32 to vector<4x512xf32>
    %7 = arith.subf %0, %6 : vector<4x512xf32>
    %8 = arith.mulf %7, %7 : vector<4x512xf32>
    %9 = vector.shape_cast %8 : vector<4x512xf32> to vector<1x4x512xf32>
    %cst_2 = arith.constant dense<0.000000e+00> : vector<1xf32>
    %10 = vector.multi_reduction <add>, %9, %cst_2 [1, 2] : vector<1x4x512xf32> to vector<1xf32>
    %11 = vector.shape_cast %10 : vector<1xf32> to vector<1x1x1xf32>
    %12 = vector.extract %11[0, 0, 0] : f32 from vector<1x1x1xf32>
    %cst_3 = arith.constant 2.047000e+03 : f32
    %13 = arith.divf %12, %cst_3 : f32
    %cst_4 = arith.constant 0.000000e+00 : f32
    %14 = arith.maximumf %13, %cst_4 : f32
    %cst_5 = arith.constant 2.000000e+00 : f32
    %15 = arith.mulf %cst_5, %14 : f32
    %16 = math.rsqrt %15 : f32
    %17 = vector.broadcast %16 : f32 to vector<4x512xf32>
    %18 = arith.mulf %7, %17 : vector<4x512xf32>
    %19 = math.erf %18 : vector<4x512xf32>
    %cst_6 = arith.constant 1.000000e+00 : f32
    %20 = vector.broadcast %cst_6 : f32 to vector<4x512xf32>
    %21 = arith.addf %20, %19 : vector<4x512xf32>
    %cst_7 = arith.constant 5.000000e-01 : f32
    %22 = vector.broadcast %cst_7 : f32 to vector<4x512xf32>
    %23 = arith.mulf %22, %21 : vector<4x512xf32>
    %cst_8 = arith.constant 1.500000e+01 : f32
    %24 = vector.broadcast %cst_8 : f32 to vector<4x512xf32>
    %25 = arith.mulf %23, %24 : vector<4x512xf32>
    %26 = math.roundeven %25 : vector<4x512xf32>
    %cst_9 = arith.constant 0.0666666701 : f32
    %27 = vector.broadcast %cst_9 : f32 to vector<4x512xf32>
    %28 = arith.mulf %26, %27 : vector<4x512xf32>
    %cst_10 = arith.constant 2.000000e+00 : f32
    %29 = vector.broadcast %cst_10 : f32 to vector<4x512xf32>
    %30 = arith.mulf %28, %29 : vector<4x512xf32>
    %cst_11 = arith.constant 1.000000e+00 : f32
    %31 = vector.broadcast %cst_11 : f32 to vector<4x512xf32>
    %32 = arith.subf %30, %31 : vector<4x512xf32>
    %c0_12 = arith.constant 0 : index
    %c0_13 = arith.constant 0 : index
    %33 = vector.load %arg2[%c0_12, %c0_13] : memref<4x512xf32, #tpu.memory_space<vmem>>, vector<4x512xf32>
    tpu.vector_store %arg2[%c0_12, %c0_13], %32 {strides = array<i32>} : memref<4x512xf32, #tpu.memory_space<vmem>>, vector<4x512xf32>,
    return
  }
  func.func @transform_0(%arg0: i32) -> (i32, i32) {
    %c0_i32 = arith.constant 0 : i32
    %c0_i32_0 = arith.constant 0 : i32
    %c0_i32_1 = arith.constant 0 : i32
    return %c0_i32, %c0_i32_0 : i32, i32
  }
  func.func @transform_1(%arg0: i32) -> (i32, i32) {
    %c0_i32 = arith.constant 0 : i32
    %c0_i32_0 = arith.constant 0 : i32
    %c0_i32_1 = arith.constant 0 : i32
    return %c0_i32, %c0_i32_0 : i32, i32
  }
}

</mosaic_0001>

<bundles_post_ra>
// kernel: _weight_quantize_impl.1
= control target key start
LH: loop header
LB: loop body
LE: loop exit
PB: predicated region body
PF: predicated region fallthrough
CT: control target
= control target key end

     0   :  { %vm23_vm0 = vcmask 1043456   ;;  %v252_v13 = vmov 2048.0   ;;  %v253_v43 = vmov 2047.0   ;;  %s254_s15 = smov 0.0   ;;  %s295_s0 = inlined_call_operand.vmem [shape: f32[4,512], index: 0, kind: input, shape index: {}]   ;;  %s296_s1 = inlined_call_operand.vmem [shape: f32[4,512], index: 1, kind: output, shape index: {}]  }
   0x1   :  { %v8_v0 = vld [vmem:[%s295_s0] sm:$0xff]  ;;  %v9_v1 = vld [vmem:[%s295_s0 + $0x8] sm:$0xff]  ;;  %242 = vrcp.f32 %v252_v13 }
   0x2   :  { %12 = vst [vmem:[#allocation1] ss:$2 sm:$0xff] %v8_v0  ;;  %244 = vrcp.f32 %v253_v43 }
   0x3   :  { %14 = vst [vmem:[#allocation1 + $0x10] ss:$2 sm:$0xff] %v9_v1 }
   0x7   :  { %v243_v14 = vpop.eup %242 }
   0x8   :  { %v41_v15 = vmul.f32 2048.0, %v243_v14  ;;  %vm45_vm1 = vweird.f32 %v243_v14  ;;  %v245_v44 = vpop.eup %244 }
   0x9   :  { %v15_v2 = vld.sshfl [vmem:[#allocation1] sm:$0xff pattern:$0x75316420]  ;;  %v16_v3 = vld.sshfl [vmem:[#allocation1 + $0x8] sm:$0xff pattern:$0x75316420]  ;;  %vm88_vm2 = vweird.f32 %v245_v44 }
   0xa   :  { %v17_v4 = vld.sshfl [vmem:[#allocation1 + $0x10] sm:$0xff pattern:$0x75316420]  ;;  %v18_v5 = vld.sshfl [vmem:[#allocation1 + $0x18] sm:$0xff pattern:$0x75316420] }
   0xb   :  { %v24_v6 = vsel %vm23_vm0, %v15_v2, 0.0  ;;  %v25_v7 = vsel %vm23_vm0, %v16_v3, 0.0  ;;  %v27_v8 = vsel %vm23_vm0, %v17_v4, 0.0  ;;  %v29_v10 = vsel %vm23_vm0, %v18_v5, 0.0 }
   0xc   :  { %v26_v9 = vadd.f32 %v25_v7, %v24_v6  ;;  %v42_v16 = vsub.f32 1.0, %v41_v15  ;;  %v84_v45 = vmul.f32 2047.0, %v245_v44 }
   0xe   :  { %v28_v11 = vadd.f32 %v27_v8, %v26_v9  ;;  %v43_v20 = vmul.f32 %v243_v14, %v42_v16  ;;  %v85_v46 = vsub.f32 1.0, %v84_v45 }
  0x10   :  { %v30_v12 = vadd.f32 %v29_v10, %v28_v11  ;;  %v44_v23 = vadd.f32 %v243_v14, %v43_v20  ;;  %v86_v50 = vmul.f32 %v245_v44, %v85_v46 }
  0x12   :  { %31 = vadd.xlane.f32.xlu0 %v30_v12  ;;  %v46_v26 = vsel %vm45_vm1, %v243_v14, %v44_v23  ;;  %v87_v53 = vadd.f32 %v245_v44, %v86_v50 }
  0x14   :  { %v89_v56 = vsel %vm88_vm2, %v245_v44, %v87_v53 }
  0x85   :  { %v32_v17 = vpop.xlane.xlu0 %31 }
  0x86   :  { %v33_v18 = vrot.slane %v32_v17, 4 }
  0x88   :  { %v34_v19 = vadd.f32 %v33_v18, %v32_v17 }
  0x8a   :  { %v35_v21 = vrot.slane %v34_v19, 2 }
  0x8c   :  { %v36_v22 = vadd.f32 %v35_v21, %v34_v19 }
  0x8e   :  { %v37_v24 = vrot.slane %v36_v22, 1 }
  0x90   :  { %v38_v25 = vadd.f32 %v37_v24, %v36_v22 }
  0x92   :  { %213 = vpush %v38_v25 }
  0x93   :  { %215 = vpush %v46_v26 }
  0xc3   :  { %s214_s0 = spop %213 }
  0xc4   :  { %s216_s10 = spop %215 }
  0xc5   :  { %s48_s11 = smul.f32 %s216_s10, %s214_s0 }
  0xc7   :  { %v49_v27 = vstv %s48_s11 }
  0xc8   :  { %v50_v28 = vsub.f32 %v8_v0, %v49_v27  ;;  %v51_v29 = vsub.f32 %v9_v1, %v49_v27 }
  0xca   :  { %v52_v30 = vmul.f32 %v50_v28, %v50_v28  ;;  %v53_v31 = vmul.f32 %v51_v29, %v51_v29 }
  0xcc   :  { %56 = vst [vmem:[#allocation1] ss:$2 sm:$0xff] %v52_v30 }
  0xcd   :  { %58 = vst [vmem:[#allocation1 + $0x10] ss:$2 sm:$0xff] %v53_v31 }
  0xd3   :  { %v59_v32 = vld.sshfl [vmem:[#allocation1] sm:$0xff pattern:$0x75316420]  ;;  %v60_v33 = vld.sshfl [vmem:[#allocation1 + $0x8] sm:$0xff pattern:$0x75316420] }
  0xd4   :  { %v61_v34 = vld.sshfl [vmem:[#allocation1 + $0x10] sm:$0xff pattern:$0x75316420]  ;;  %v67_v35 = vsel %vm23_vm0, %v59_v32, 0.0  ;;  %v68_v36 = vsel %vm23_vm0, %v60_v33, 0.0 }
  0xd5   :  { %v62_v37 = vld.sshfl [vmem:[#allocation1 + $0x18] sm:$0xff pattern:$0x75316420]  ;;  %v69_v38 = vadd.f32 %v68_v36, %v67_v35  ;;  %v70_v39 = vsel %vm23_vm0, %v61_v34, 0.0 }
  0xd6   :  { %v72_v41 = vsel %vm23_vm0, %v62_v37, 0.0 }
  0xd7   :  { %v71_v40 = vadd.f32 %v70_v39, %v69_v38 }
  0xd9   :  { %v73_v42 = vadd.f32 %v72_v41, %v71_v40 }
  0xdb   :  { %74 = vadd.xlane.f32.xlu0 %v73_v42 }
 0x14e   :  { %v75_v47 = vpop.xlane.xlu0 %74 }
 0x14f   :  { %v76_v48 = vrot.slane %v75_v47, 4 }
 0x151   :  { %v77_v49 = vadd.f32 %v76_v48, %v75_v47 }
 0x153   :  { %v78_v51 = vrot.slane %v77_v49, 2 }
 0x155   :  { %v79_v52 = vadd.f32 %v78_v51, %v77_v49 }
 0x157   :  { %v80_v54 = vrot.slane %v79_v52, 1 }
 0x159   :  { %v81_v55 = vadd.f32 %v80_v54, %v79_v52 }
 0x15b   :  { %217 = vpush %v81_v55 }
 0x15c   :  { %219 = vpush %v89_v56 }
 0x18c   :  { %s218_s12 = spop %217 }
 0x18d   :  { %s220_s13 = spop %219 }
 0x18e   :  { %s91_s14 = smul.f32 %s220_s13, %s218_s12 }
 0x190   :  { %s92_s16 = smax.f32 %s254_s15, %s91_s14 }
 0x191   :  { %s93_s17 = smul.f32 2.0, %s92_s16 }
 0x193   :  { %v94_v57 = vstv %s93_s17 }
 0x194   :  { %246 = vrsqrt.f32 %v94_v57  ;;  %vm101_vm4 = vweird.f32 %v94_v57 }
 0x19a   :  { %v247_v58 = vpop.eup %246 }
 0x19b   :  { %v96_v59 = vmul.f32 %v247_v58, %v94_v57  ;;  %vm102_vm3 = vweird.f32 %v247_v58 }
 0x19c   :  { %vm103_vm5 = vmor %vm101_vm4, %vm102_vm3 }
 0x19d   :  { %v97_v60 = vmul.f32 %v247_v58, %v96_v59 }
 0x19f   :  { %v98_v61 = vmul.f32 0.5, %v97_v60 }
 0x1a1   :  { %v99_v62 = vsub.f32 1.5, %v98_v61 }
 0x1a3   :  { %v100_v63 = vmul.f32 %v247_v58, %v99_v62 }
 0x1a5   :  { %v104_v0 = vsel %vm103_vm5, %v247_v58, %v100_v63 }
 0x1a6   :  { %221 = vpush %v104_v0 }
 0x1d7   :  { %s222_s18 = spop %221 }
 0x1d8   :  { %v106_v1 = vstv %s222_s18 }
 0x1d9   :  { %v279_v2 = vmul.f32 %v106_v1, %v50_v28  ;;  %v281_v3 = vmul.f32 %v106_v1, %v51_v29 }
 0x1db   :  { %v109_v4 = vmul.f32 %v279_v2, %v279_v2  ;;  %v149_v5 = vmul.f32 %v281_v3, %v281_v3 }
 0x1dd   :  { %v110_v6 = vmin.f32 %v109_v4, 16.0  ;;  %v150_v7 = vmin.f32 %v149_v5, 16.0 }
 0x1df   :  { %v111_v8 = vmul.f32 2.1237322e-06, %v110_v6  ;;  %v122_v9 = vmul.f32 3.8918573e-05, %v110_v6  ;;  %v151_v10 = vmul.f32 2.1237322e-06, %v150_v7 }
 0x1e0   :  { %v162_v11 = vmul.f32 3.8918573e-05, %v150_v7 }
 0x1e1   :  { %v112_v12 = vadd.f32 0.00028619796, %v111_v8  ;;  %v123_v13 = vadd.f32 0.001143296, %v122_v9  ;;  %v152_v14 = vadd.f32 0.00028619796, %v151_v10 }
 0x1e2   :  { %v163_v15 = vadd.f32 0.001143296, %v162_v11 }
 0x1e3   :  { %v113_v16 = vmul.f32 %v112_v12, %v110_v6  ;;  %v124_v17 = vmul.f32 %v123_v13, %v110_v6  ;;  %v153_v18 = vmul.f32 %v152_v14, %v150_v7 }
 0x1e4   :  { %v164_v19 = vmul.f32 %v163_v15, %v150_v7 }
 0x1e5   :  { %v114_v20 = vadd.f32 0.0036580483, %v113_v16  ;;  %v125_v21 = vadd.f32 0.014752088, %v124_v17  ;;  %v154_v24 = vadd.f32 0.0036580483, %v153_v18 }
 0x1e6   :  { %v165_v22 = vadd.f32 0.014752088, %v164_v19 }
 0x1e7   :  { %v126_v23 = vmul.f32 %v125_v21, %v110_v6  ;;  %v115_v26 = vmul.f32 %v114_v20, %v110_v6  ;;  %v155_v30 = vmul.f32 %v154_v24, %v150_v7 }
 0x1e8   :  { %v166_v25 = vmul.f32 %v165_v22, %v150_v7 }
 0x1e9   :  { %v127_v27 = vadd.f32 0.112945676, %v126_v23  ;;  %v116_v32 = vadd.f32 0.05243302, %v115_v26  ;;  %v156_v36 = vadd.f32 0.05243302, %v155_v30 }
 0x1ea   :  { %v167_v28 = vadd.f32 0.112945676, %v166_v25 }
 0x1eb   :  { %v128_v29 = vmul.f32 %v127_v27, %v110_v6  ;;  %v117_v38 = vmul.f32 %v116_v32, %v110_v6  ;;  %v157_v41 = vmul.f32 %v156_v36, %v150_v7 }
 0x1ec   :  { %v168_v31 = vmul.f32 %v167_v28, %v150_v7 }
 0x1ed   :  { %v129_v33 = vadd.f32 0.4994258, %v128_v29  ;;  %v118_v42 = vadd.f32 0.18741608, %v117_v38  ;;  %v158_v43 = vadd.f32 0.18741608, %v157_v41 }
 0x1ee   :  { %v169_v34 = vadd.f32 0.4994258, %v168_v31 }
 0x1ef   :  { %v130_v35 = vmul.f32 %v129_v33, %v110_v6  ;;  %v119_v45 = vmul.f32 %v118_v42, %v110_v6  ;;  %v159_v48 = vmul.f32 %v158_v43, %v150_v7 }
 0x1f0   :  { %v170_v37 = vmul.f32 %v169_v34, %v150_v7 }
 0x1f1   :  { %v131_v39 = vadd.f32 1.0, %v130_v35  ;;  %v120_v51 = vadd.f32 1.1283791, %v119_v45  ;;  %v160_v57 = vadd.f32 1.1283791, %v159_v48 }
 0x1f2   :  { %v171_v40 = vadd.f32 1.0, %v170_v37 }
 0x1f3   :  { %248 = vrcp.f32 %v131_v39  ;;  %v143_v52 = vand.u32 2147483648, %v131_v39  ;;  %v141_v55 = vand.u32 2147483647, %v131_v39  ;;  %vm137_vm8 = vweird.f32 %v131_v39 }
 0x1f4   :  { %250 = vrcp.f32 %v171_v40  ;;  %v183_v56 = vand.u32 2147483648, %v171_v40  ;;  %v181_v59 = vand.u32 2147483647, %v171_v40  ;;  %vm177_vm10 = vweird.f32 %v171_v40 }
 0x1f5   :  { %v144_v61 = vor.u32 1.1754944e-38, %v143_v52  ;;  %v121_v63 = vmul.f32 %v120_v51, %v279_v2  ;;  %vm142_vm11 = vcmp.eq.f32.partialorder %v141_v55, 8.507059e+37  ;;  %v161_v5 = vmul.f32 %v160_v57, %v281_v3 }
 0x1f6   :  { %v184_v1 = vor.u32 1.1754944e-38, %v183_v56  ;;  %vm182_vm13 = vcmp.eq.f32.partialorder %v181_v59, 8.507059e+37 }
 0x1f9   :  { %v249_v44 = vpop.eup %248 }
 0x1fa   :  { %v251_v46 = vpop.eup %250  ;;  %v133_v47 = vmul.f32 %v249_v44, %v131_v39  ;;  %vm138_vm6 = vweird.f32 %v249_v44 }
 0x1fb   :  { %v173_v49 = vmul.f32 %v251_v46, %v171_v40  ;;  %vm178_vm7 = vweird.f32 %v251_v46  ;;  %vm139_vm9 = vmor %vm137_vm8, %vm138_vm6 }
 0x1fc   :  { %v134_v50 = vsub.f32 1.0, %v133_v47  ;;  %vm179_vm12 = vmor %vm177_vm10, %vm178_vm7 }
 0x1fd   :  { %v174_v53 = vsub.f32 1.0, %v173_v49 }
 0x1fe   :  { %v135_v54 = vmul.f32 %v249_v44, %v134_v50 }
 0x1ff   :  { %v175_v58 = vmul.f32 %v251_v46, %v174_v53 }
 0x200   :  { %v136_v60 = vadd.f32 %v249_v44, %v135_v54 }
 0x201   :  { %v176_v62 = vadd.f32 %v251_v46, %v175_v58 }
 0x202   :  { %v140_v0 = vsel %vm139_vm9, %v249_v44, %v136_v60 }
 0x203   :  { %v145_v4 = vsel %vm142_vm11, %v144_v61, %v140_v0  ;;  %v180_v6 = vsel %vm179_vm12, %v251_v46, %v176_v62 }
 0x204   :  { %v146_v7 = vmul.f32 %v145_v4, %v121_v63  ;;  %v185_v8 = vsel %vm182_vm13, %v184_v1, %v180_v6 }
 0x205   :  { %v186_v9 = vmul.f32 %v185_v8, %v161_v5 }
 0x206   :  { %v209_v10 = vclamps-f32 %v146_v7, 1.0 }
 0x207   :  { %v210_v11 = vclamps-f32 %v186_v9, 1.0 }
 0x208   :  { %v189_v12 = vadd.f32 1.0, %v209_v10 }
 0x209   :  { %v190_v13 = vadd.f32 1.0, %v210_v11 }
 0x20a   :  { %v191_v14 = vmul.f32 0.5, %v189_v12 }
 0x20b   :  { %v192_v15 = vmul.f32 0.5, %v190_v13 }
 0x20c   :  { %v193_v16 = vmul.f32 15.0, %v191_v14 }
 0x20d   :  { %v194_v2 = vmul.f32 15.0, %v192_v15 }
 0x20e   :  { %v225_v17 = vcvt.f32.s32 %v193_v16  ;;  %v223_v20 = vand.u32 2147483647, %v193_v16  ;;  %v228_v3 = vand.u32 2147483648, %v193_v16 }
 0x20f   :  { %v233_v18 = vcvt.f32.s32 %v194_v2  ;;  %v231_v23 = vand.u32 2147483647, %v194_v2  ;;  %v236_v25 = vand.u32 2147483648, %v194_v2 }
 0x210   :  { %v226_v19 = vcvt.s32.f32 %v225_v17  ;;  %vm224_vm14 = vcmp.lt.f32.partialorder %v223_v20, 8388608.0 }
 0x211   :  { %v234_v21 = vcvt.s32.f32 %v233_v18  ;;  %vm232_vm15 = vcmp.lt.f32.partialorder %v231_v23, 8388608.0 }
 0x212   :  { %v227_v22 = vand.u32 2147483647, %v226_v19 }
 0x213   :  { %v235_v24 = vand.u32 2147483647, %v234_v21 }
 0x214   :  { %v229_v26 = vor.u32 %v228_v3, %v227_v22 }
 0x215   :  { %v237_v27 = vor.u32 %v236_v25, %v235_v24 }
 0x216   :  { %v230_v28 = vsel %vm224_vm14, %v229_v26, %v193_v16 }
 0x217   :  { %v238_v29 = vsel %vm232_vm15, %v237_v27, %v194_v2  ;;  %v197_v30 = vmul.f32 0.06666667, %v230_v28 }
 0x218   :  { %v198_v31 = vmul.f32 0.06666667, %v238_v29 }
 0x219   :  { %v199_v32 = vmul.f32 2.0, %v197_v30 }
 0x21a   :  { %v200_v33 = vmul.f32 2.0, %v198_v31 }
 0x21b   :  { %v211_v34 = vadd.f32 -1.0, %v199_v32 }
 0x21c   :  { %v212_v35 = vadd.f32 -1.0, %v200_v33 }
 0x21d   :  { %203 = vst [vmem:[%s296_s1] sm:$0xff] %v211_v34 }
 0x21e   :  { %204 = vst [vmem:[%s296_s1 + $0x8] sm:$0xff] %v212_v35 }

</bundles_post_ra>
